<compile_context>
chip_gen: v7x
topology: tpu7x:2x2x1
jax: 0.10.0
libtpu: 0.0.40
codegen_flags: <defaults>
</compile_context>

<pallas_src>
import jax
import jax.numpy as jnp
from jax.experimental import pallas as pl
from jax.experimental.pallas import tpu as pltpu

_EPS = 1e-5                     # PyTorch BatchNorm1d default eps
_INV_SQRT2 = 0.7071067811865476
_MXU_DTYPE = jnp.bfloat16       # matmul-operand dtype; set jnp.float32 for bit-faithful f32


def _bn_train(h, gamma, beta):
    """BatchNorm1d, training mode: biased batch statistics over the batch axis."""
    mean = jnp.mean(h, axis=0, keepdims=True)
    var = jnp.mean((h - mean) ** 2, axis=0, keepdims=True)
    return (h - mean) * jax.lax.rsqrt(var + _EPS) * gamma + beta


def _erf(x):
    # Abramowitz & Stegun 7.1.26 rational approximation, |err| <= 1.5e-7.
    # Built only from exp / mul / add / div / compare, so it lowers on all TPU
    # generations and the exp lands in the otherwise-idle EUP slot.
    a1, a2, a3, a4, a5 = (0.254829592, -0.284496736, 1.421413741,
                          -1.453152027, 1.061405429)
    p = 0.3275911
    ax = jnp.abs(x)
    t = 1.0 / (1.0 + p * ax)
    poly = ((((a5 * t + a4) * t + a3) * t + a2) * t + a1) * t
    y = 1.0 - poly * jnp.exp(-ax * ax)
    return jnp.where(x >= 0.0, y, -y)


def _gelu_exact(h):
    """nn.GELU() default = exact erf-based GELU."""
    # TODO(synk): jax.nn.gelu(approximate=True) (tanh on the EUP) is cheaper if the
    # tolerance budget ever allows diverging from nn.GELU()'s exact-erf default.
    return 0.5 * h * (1.0 + _erf(h * _INV_SQRT2))


def classification_kernel(x_ref, w1_ref, gb1_ref, w2_ref, gb2_ref, o_ref, pmax_ref):
    s = pl.program_id(0)

    # MaxPool1d(seq_len) streamed over seq tiles: x stays in PyTorch NCL layout
    # (N, d_model, tile_s), so the pool is a lane (XLU) reduce; the running max lives
    # in a small (N, d_model) f32 VMEM accumulator that persists across grid steps.
    @pl.when(s == 0)
    def _():
        pmax_ref[...] = jnp.full(pmax_ref.shape, -jnp.inf, dtype=pmax_ref.dtype)

    pmax_ref[...] = jnp.maximum(pmax_ref[...], jnp.max(x_ref[...], axis=2))

    # MLP head runs once, after the last seq tile.  The full batch is in one block,
    # so train-mode BatchNorm statistics are exact.
    @pl.when(s == pl.num_programs(0) - 1)
    def _():
        pooled = pmax_ref[...]                                           # (N, d_model) f32

        # fc1 + BN1 + GELU.  fc1 bias omitted: cancelled exactly by BN1's batch-mean
        # subtraction (training mode).  MXU operands in bf16, f32 accumulation.
        h = jnp.dot(pooled.astype(w1_ref.dtype), w1_ref[...],
                    preferred_element_type=jnp.float32)                  # (N, d_hidden)
        h = _gelu_exact(_bn_train(h, gb1_ref[0:1, :], gb1_ref[1:2, :]))

        # fc2 + BN2 + Sigmoid.  fc2 bias likewise cancelled by BN2.
        z = jnp.dot(h.astype(w2_ref.dtype), w2_ref[...],
                    preferred_element_type=jnp.float32)                  # (N, 2)
        o_ref[...] = jax.nn.sigmoid(_bn_train(z, gb2_ref[0:1, :], gb2_ref[1:2, :]))


def _pick_tile_s(n, d_model, seq_len, itemsize, budget_bytes=12 * 1024 * 1024):
    """Largest seq tile that (a) satisfies the (8,128) lane rule on the last dim and
    (b) keeps a double-buffered x tile well inside scoped VMEM on v5e/v6e/v7x."""
    if seq_len % 128 != 0:
        return seq_len                      # last-dim tile must equal the full dim
    for cand in (1024, 512, 256, 128):
        if seq_len % cand == 0 and n * d_model * cand * itemsize <= budget_bytes:
            return cand
    return 128


@jax.jit
def classification_forward(x_ncl, params):
    """x_ncl: (N, d_model, seq_len) -- PyTorch NCL layout, fed straight to the kernel
    (no wrapper-side transpose; the seq-max is a lane reduce inside the kernel)."""
    N, d_model, seq_len = x_ncl.shape
    w1, gb1, w2, gb2 = params["w1"], params["gb1"], params["w2"], params["gb2"]
    d_hidden = w1.shape[1]

    tile_s = _pick_tile_s(N, d_model, seq_len, x_ncl.dtype.itemsize)
    grid = (seq_len // tile_s,)

    # VMEM budget: x tile double-buffered + params + out + running-max scratch.
    x_tile_bytes = N * d_model * tile_s * x_ncl.dtype.itemsize
    param_bytes = sum(int(a.size) * a.dtype.itemsize for a in (w1, gb1, w2, gb2))
    fixed_bytes = param_bytes + N * 2 * 4 + N * d_model * 4
    vmem_limit = int(min(48 * 1024 * 1024,
                         max(8 * 1024 * 1024,
                             2 * x_tile_bytes + 2 * fixed_bytes + (1 << 20))))

    cost = pl.CostEstimate(
        flops=2 * N * (d_model * d_hidden + d_hidden * 2) + N * d_model * seq_len,
        transcendentals=N * d_hidden + N * 2,
        bytes_accessed=int(x_ncl.size) * x_ncl.dtype.itemsize + param_bytes + N * 2 * 4,
    )

    # TODO(synk): add a parallel batch-tile grid axis for v7x's two TensorCores; that
    # requires two-pass (sum/sumsq) BatchNorm statistics across batch tiles.
    # TODO(synk): ship x in bf16 on v6e/v7x to halve the dominant HBM read (keep the
    # max-compare in f32 on v5e, which has no bf16 VPU).
    return pl.pallas_call(
        classification_kernel,
        out_shape=jax.ShapeDtypeStruct((N, 2), jnp.float32),
        grid=grid,
        in_specs=[
            pl.BlockSpec((N, d_model, tile_s), lambda s: (0, 0, s)),   # x (NCL), streamed
            pl.BlockSpec((d_model, d_hidden), lambda s: (0, 0)),       # w1 (bf16)
            pl.BlockSpec((2, d_hidden), lambda s: (0, 0)),             # [gamma1; beta1]
            pl.BlockSpec((d_hidden, 2), lambda s: (0, 0)),             # w2 (bf16)
            pl.BlockSpec((2, 2), lambda s: (0, 0)),                    # [gamma2; beta2]
        ],
        out_specs=pl.BlockSpec((N, 2), lambda s: (0, 0)),
        scratch_shapes=[pltpu.VMEM((N, d_model), jnp.float32)],        # running seq-max
        compiler_params=pltpu.CompilerParams(
            dimension_semantics=("arbitrary",),
            vmem_limit_bytes=vmem_limit,
        ),
        cost_estimate=cost,
    )(x_ncl, w1, gb1, w2, gb2)


def init_params(key, d_model, d_hidden):
    """PyTorch-style parameters (linear weights stored transposed: (in, out))."""
    ks = jax.random.split(key, 8)
    bound1 = 1.0 / jnp.sqrt(d_model)
    bound2 = 1.0 / jnp.sqrt(d_hidden)
    return {
        "w1": jax.random.uniform(ks[0], (d_model, d_hidden), jnp.float32, -bound1, bound1),
        "b1": jax.random.uniform(ks[1], (1, d_hidden), jnp.float32, -bound1, bound1),
        "g1": 1.0 + 0.1 * jax.random.normal(ks[2], (1, d_hidden), jnp.float32),
        "be1": 0.1 * jax.random.normal(ks[3], (1, d_hidden), jnp.float32),
        "w2": jax.random.uniform(ks[4], (d_hidden, 2), jnp.float32, -bound2, bound2),
        "b2": jax.random.uniform(ks[5], (1, 2), jnp.float32, -bound2, bound2),
        "g2": 1.0 + 0.1 * jax.random.normal(ks[6], (1, 2), jnp.float32),
        "be2": 0.1 * jax.random.normal(ks[7], (1, 2), jnp.float32),
    }


def pack_params(p):
    """One-time repack for the kernel.  fc biases b1/b2 are intentionally NOT forwarded:
    a per-feature constant added right before a train-mode BatchNorm is cancelled
    exactly by the batch-mean subtraction.  (If eval-mode BN / running statistics are
    ever used, the biases must be reinstated.)"""
    return {
        "w1": p["w1"].astype(_MXU_DTYPE),
        "gb1": jnp.concatenate([p["g1"], p["be1"]], axis=0).astype(jnp.float32),
        "w2": p["w2"].astype(_MXU_DTYPE),
        "gb2": jnp.concatenate([p["g2"], p["be2"]], axis=0).astype(jnp.float32),
    }
    # TODO(synk): emit BatchNorm running_mean/var buffer updates if that training-mode
    # side effect is ever needed; only the forward output tensor is produced here.


def reference_forward(x_ncl, p):
    """Pure-JAX f32 reference, faithful to the PyTorch module (biases included,
    NCL layout, pool over the sequence axis, exact erf GELU)."""
    pooled = jnp.max(x_ncl, axis=2)
    h = pooled @ p["w1"] + p["b1"]
    h = _bn_train(h, p["g1"], p["be1"])
    h = 0.5 * h * (1.0 + jax.lax.erf(h * _INV_SQRT2))
    z = h @ p["w2"] + p["b2"]
    return jax.nn.sigmoid(_bn_train(z, p["g2"], p["be2"]))


if __name__ == "__main__":
    N, seq_len, d_model, d_hidden = 8, 8, 32, 32
    key = jax.random.PRNGKey(0)
    kx, kp = jax.random.split(key)

    x = jax.random.normal(kx, (N, d_model, seq_len), jnp.float32)   # PyTorch NCL layout
    torch_style = init_params(kp, d_model, d_hidden)
    kernel_params = pack_params(torch_style)                        # one-time repack

    out = classification_forward(x, kernel_params)
    out = jax.block_until_ready(out)

    ref = reference_forward(x, torch_style)
    assert out.shape == (N, 2), out.shape
    # Tolerance budget: bf16 MXU operands (f32 accumulation) vs. the all-f32 reference.
    assert jnp.allclose(out, ref, atol=2e-2, rtol=0.0), (float(jnp.abs(out - ref).max()), out, ref)
    print("KERNEL_OK")
</pallas_src>

<mosaic_0001>
module attributes {stable_mosaic.version = 11 : i64} {
  func.func @classification_kernel(%arg0: i32, %arg1: memref<8x32x8xf32, #tpu.memory_space<vmem>>, %arg2: memref<32x32xbf16, #tpu.memory_space<vmem>>, %arg3: memref<2x32xf32, #tpu.memory_space<vmem>>, %arg4: memref<32x2xbf16, #tpu.memory_space<vmem>>, %arg5: memref<2x2xf32, #tpu.memory_space<vmem>>, %arg6: memref<8x2xf32, #tpu.memory_space<vmem>>, %arg7: memref<8x32xf32, #tpu.memory_space<vmem>>) attributes {dimension_semantics = [#tpu.dimension_semantics<arbitrary>], iteration_bounds = array<i64: 1>, scalar_prefetch = 0 : i64, scratch_operands = 1 : i64, tpu.core_type = #tpu.core_type<tc>, window_params = [{transform_indices = @transform_0, window_bounds = array<i64: 8, 32, 8>}, {pipeline_mode = #tpu.pipeline_mode<synchronous>, transform_indices = @transform_1, window_bounds = array<i64: 32, 32>}, {pipeline_mode = #tpu.pipeline_mode<synchronous>, transform_indices = @transform_2, window_bounds = array<i64: 2, 32>}, {pipeline_mode = #tpu.pipeline_mode<synchronous>, transform_indices = @transform_3, window_bounds = array<i64: 32, 2>}, {pipeline_mode = #tpu.pipeline_mode<synchronous>, transform_indices = @transform_4, window_bounds = array<i64: 2, 2>}, {pipeline_mode = #tpu.pipeline_mode<synchronous>, transform_indices = @transform_5, window_bounds = array<i64: 8, 2>}]} {
    %c0_i32 = arith.constant 0 : i32
    %0 = arith.cmpi eq, %arg0, %c0_i32 : i32
    %1 = arith.extui %0 : i1 to i32
    %c0_i32_0 = arith.constant 0 : i32
    %2 = arith.cmpi ne, %1, %c0_i32_0 : i32
    scf.if %2 {
      %cst_9 = arith.constant 0xFF800000 : f32
      %11 = vector.broadcast %cst_9 : f32 to vector<8x32xf32>
      %c0_10 = arith.constant 0 : index
      %c0_11 = arith.constant 0 : index
      %12 = vector.load %arg7[%c0_10, %c0_11] : memref<8x32xf32, #tpu.memory_space<vmem>>, vector<8x32xf32>
      tpu.vector_store %arg7[%c0_10, %c0_11], %11 {strides = array<i32>} : memref<8x32xf32, #tpu.memory_space<vmem>>, vector<8x32xf32>,
    } else {
    }
    %c0 = arith.constant 0 : index
    %c0_1 = arith.constant 0 : index
    %3 = vector.load %arg7[%c0, %c0_1] : memref<8x32xf32, #tpu.memory_space<vmem>>, vector<8x32xf32>
    %c0_2 = arith.constant 0 : index
    %c0_3 = arith.constant 0 : index
    %c0_4 = arith.constant 0 : index
    %4 = vector.load %arg1[%c0_2, %c0_3, %c0_4] : memref<8x32x8xf32, #tpu.memory_space<vmem>>, vector<8x32x8xf32>
    %cst = arith.constant dense<0xFF800000> : vector<8x32xf32>
    %5 = vector.multi_reduction <maximumf>, %4, %cst [2] : vector<8x32x8xf32> to vector<8x32xf32>
    %6 = arith.maximumf %3, %5 : vector<8x32xf32>
    %c0_5 = arith.constant 0 : index
    %c0_6 = arith.constant 0 : index
    %7 = vector.load %arg7[%c0_5, %c0_6] : memref<8x32xf32, #tpu.memory_space<vmem>>, vector<8x32xf32>
    tpu.vector_store %arg7[%c0_5, %c0_6], %6 {strides = array<i32>} : memref<8x32xf32, #tpu.memory_space<vmem>>, vector<8x32xf32>,
    %c0_i32_7 = arith.constant 0 : i32
    %8 = arith.cmpi eq, %arg0, %c0_i32_7 : i32
    %9 = arith.extui %8 : i1 to i32
    %c0_i32_8 = arith.constant 0 : i32
    %10 = arith.cmpi ne, %9, %c0_i32_8 : i32
    scf.if %10 {
      %c0_9 = arith.constant 0 : index
      %c0_10 = arith.constant 0 : index
      %11 = vector.load %arg7[%c0_9, %c0_10] : memref<8x32xf32, #tpu.memory_space<vmem>>, vector<8x32xf32>
      %12 = arith.truncf %11 : vector<8x32xf32> to vector<8x32xbf16>
      %c0_11 = arith.constant 0 : index
      %c0_12 = arith.constant 0 : index
      %13 = vector.load %arg2[%c0_11, %c0_12] : memref<32x32xbf16, #tpu.memory_space<vmem>>, vector<32x32xbf16>
      %cst_13 = arith.constant dense<0.000000e+00> : vector<8x32xf32>
      %14 = tpu.matmul %12, %13, %cst_13 {dimension_numbers = #tpu.dot_dimension_numbers<[1], [0], [0], [1], [0, 0, 1, 1], [], []>} : vector<8x32xbf16>, vector<32x32xbf16>, vector<8x32xf32> -> vector<8x32xf32>
      %c0_14 = arith.constant 0 : index
      %c0_15 = arith.constant 0 : index
      %15 = vector.load %arg3[%c0_14, %c0_15] : memref<2x32xf32, #tpu.memory_space<vmem>>, vector<1x32xf32>
      %c1 = arith.constant 1 : index
      %c0_16 = arith.constant 0 : index
      %16 = vector.load %arg3[%c1, %c0_16] : memref<2x32xf32, #tpu.memory_space<vmem>>, vector<1x32xf32>
      %cst_17 = arith.constant dense<0.000000e+00> : vector<32xf32>
      %17 = vector.multi_reduction <add>, %14, %cst_17 [0] : vector<8x32xf32> to vector<32xf32>
      %18 = vector.shape_cast %17 : vector<32xf32> to vector<1x32xf32>
      %cst_18 = arith.constant 8.000000e+00 : f32
      %19 = vector.broadcast %cst_18 : f32 to vector<1x32xf32>
      %20 = arith.divf %18, %19 : vector<1x32xf32>
      %21 = vector.broadcast %20 : vector<1x32xf32> to vector<8x32xf32>
      %22 = arith.subf %14, %21 : vector<8x32xf32>
      %23 = arith.mulf %22, %22 : vector<8x32xf32>
      %cst_19 = arith.constant dense<0.000000e+00> : vector<32xf32>
      %24 = vector.multi_reduction <add>, %23, %cst_19 [0] : vector<8x32xf32> to vector<32xf32>
      %25 = vector.shape_cast %24 : vector<32xf32> to vector<1x32xf32>
      %cst_20 = arith.constant 8.000000e+00 : f32
      %26 = vector.broadcast %cst_20 : f32 to vector<1x32xf32>
      %27 = arith.divf %25, %26 : vector<1x32xf32>
      %28 = vector.broadcast %20 : vector<1x32xf32> to vector<8x32xf32>
      %29 = arith.subf %14, %28 : vector<8x32xf32>
      %cst_21 = arith.constant 9.99999974E-6 : f32
      %30 = vector.broadcast %cst_21 : f32 to vector<1x32xf32>
      %31 = arith.addf %27, %30 : vector<1x32xf32>
      %32 = math.rsqrt %31 : vector<1x32xf32>
      %33 = vector.broadcast %32 : vector<1x32xf32> to vector<8x32xf32>
      %34 = arith.mulf %29, %33 : vector<8x32xf32>
      %35 = vector.broadcast %15 : vector<1x32xf32> to vector<8x32xf32>
      %36 = arith.mulf %34, %35 : vector<8x32xf32>
      %37 = vector.broadcast %16 : vector<1x32xf32> to vector<8x32xf32>
      %38 = arith.addf %36, %37 : vector<8x32xf32>
      %cst_22 = arith.constant 5.000000e-01 : f32
      %39 = vector.broadcast %cst_22 : f32 to vector<8x32xf32>
      %40 = arith.mulf %39, %38 : vector<8x32xf32>
      %cst_23 = arith.constant 0.707106769 : f32
      %41 = vector.broadcast %cst_23 : f32 to vector<8x32xf32>
      %42 = arith.mulf %38, %41 : vector<8x32xf32>
      %43 = math.absf %42 : vector<8x32xf32>
      %cst_24 = arith.constant 0.327591091 : f32
      %44 = vector.broadcast %cst_24 : f32 to vector<8x32xf32>
      %45 = arith.mulf %44, %43 : vector<8x32xf32>
      %cst_25 = arith.constant 1.000000e+00 : f32
      %46 = vector.broadcast %cst_25 : f32 to vector<8x32xf32>
      %47 = arith.addf %46, %45 : vector<8x32xf32>
      %cst_26 = arith.constant 1.000000e+00 : f32
      %48 = vector.broadcast %cst_26 : f32 to vector<8x32xf32>
      %49 = arith.divf %48, %47 : vector<8x32xf32>
      %cst_27 = arith.constant 1.06140542 : f32
      %50 = vector.broadcast %cst_27 : f32 to vector<8x32xf32>
      %51 = arith.mulf %50, %49 : vector<8x32xf32>
      %cst_28 = arith.constant -1.45315206 : f32
      %52 = vector.broadcast %cst_28 : f32 to vector<8x32xf32>
      %53 = arith.addf %51, %52 : vector<8x32xf32>
      %54 = arith.mulf %53, %49 : vector<8x32xf32>
      %cst_29 = arith.constant 1.42141378 : f32
      %55 = vector.broadcast %cst_29 : f32 to vector<8x32xf32>
      %56 = arith.addf %54, %55 : vector<8x32xf32>
      %57 = arith.mulf %56, %49 : vector<8x32xf32>
      %cst_30 = arith.constant -0.284496725 : f32
      %58 = vector.broadcast %cst_30 : f32 to vector<8x32xf32>
      %59 = arith.addf %57, %58 : vector<8x32xf32>
      %60 = arith.mulf %59, %49 : vector<8x32xf32>
      %cst_31 = arith.constant 0.254829586 : f32
      %61 = vector.broadcast %cst_31 : f32 to vector<8x32xf32>
      %62 = arith.addf %60, %61 : vector<8x32xf32>
      %63 = arith.mulf %62, %49 : vector<8x32xf32>
      %cst_32 = arith.constant 0.000000e+00 : f32
      %64 = vector.broadcast %cst_32 : f32 to vector<8x32xf32>
      %65 = arith.subf %64, %43 : vector<8x32xf32>
      %66 = arith.mulf %65, %43 : vector<8x32xf32>
      %67 = math.exp %66 : vector<8x32xf32>
      %68 = arith.mulf %63, %67 : vector<8x32xf32>
      %cst_33 = arith.constant 1.000000e+00 : f32
      %69 = vector.broadcast %cst_33 : f32 to vector<8x32xf32>
      %70 = arith.subf %69, %68 : vector<8x32xf32>
      %cst_34 = arith.constant 0.000000e+00 : f32
      %71 = vector.broadcast %cst_34 : f32 to vector<8x32xf32>
      %72 = arith.cmpf oge, %42, %71 : vector<8x32xf32>
      %cst_35 = arith.constant 0.000000e+00 : f32
      %73 = vector.broadcast %cst_35 : f32 to vector<8x32xf32>
      %74 = arith.subf %73, %70 : vector<8x32xf32>
      %75 = arith.select %72, %70, %74 : vector<8x32xi1>, vector<8x32xf32>
      %cst_36 = arith.constant 1.000000e+00 : f32
      %76 = vector.broadcast %cst_36 : f32 to vector<8x32xf32>
      %77 = arith.addf %76, %75 : vector<8x32xf32>
      %78 = arith.mulf %40, %77 : vector<8x32xf32>
      %79 = arith.truncf %78 : vector<8x32xf32> to vector<8x32xbf16>
      %c0_37 = arith.constant 0 : index
      %c0_38 = arith.constant 0 : index
      %80 = vector.load %arg4[%c0_37, %c0_38] : memref<32x2xbf16, #tpu.memory_space<vmem>>, vector<32x2xbf16>
      %cst_39 = arith.constant dense<0.000000e+00> : vector<8x2xf32>
      %81 = tpu.matmul %79, %80, %cst_39 {dimension_numbers = #tpu.dot_dimension_numbers<[1], [0], [0], [1], [0, 0, 1, 1], [], []>} : vector<8x32xbf16>, vector<32x2xbf16>, vector<8x2xf32> -> vector<8x2xf32>
      %c0_40 = arith.constant 0 : index
      %c0_41 = arith.constant 0 : index
      %82 = vector.load %arg5[%c0_40, %c0_41] : memref<2x2xf32, #tpu.memory_space<vmem>>, vector<1x2xf32>
      %c1_42 = arith.constant 1 : index
      %c0_43 = arith.constant 0 : index
      %83 = vector.load %arg5[%c1_42, %c0_43] : memref<2x2xf32, #tpu.memory_space<vmem>>, vector<1x2xf32>
      %cst_44 = arith.constant dense<0.000000e+00> : vector<2xf32>
      %84 = vector.multi_reduction <add>, %81, %cst_44 [0] : vector<8x2xf32> to vector<2xf32>
      %85 = vector.shape_cast %84 : vector<2xf32> to vector<1x2xf32>
      %cst_45 = arith.constant 8.000000e+00 : f32
      %86 = vector.broadcast %cst_45 : f32 to vector<1x2xf32>
      %87 = arith.divf %85, %86 : vector<1x2xf32>
      %88 = vector.broadcast %87 : vector<1x2xf32> to vector<8x2xf32>
      %89 = arith.subf %81, %88 : vector<8x2xf32>
      %90 = arith.mulf %89, %89 : vector<8x2xf32>
      %cst_46 = arith.constant dense<0.000000e+00> : vector<2xf32>
      %91 = vector.multi_reduction <add>, %90, %cst_46 [0] : vector<8x2xf32> to vector<2xf32>
      %92 = vector.shape_cast %91 : vector<2xf32> to vector<1x2xf32>
      %cst_47 = arith.constant 8.000000e+00 : f32
      %93 = vector.broadcast %cst_47 : f32 to vector<1x2xf32>
      %94 = arith.divf %92, %93 : vector<1x2xf32>
      %95 = vector.broadcast %87 : vector<1x2xf32> to vector<8x2xf32>
      %96 = arith.subf %81, %95 : vector<8x2xf32>
      %cst_48 = arith.constant 9.99999974E-6 : f32
      %97 = vector.broadcast %cst_48 : f32 to vector<1x2xf32>
      %98 = arith.addf %94, %97 : vector<1x2xf32>
      %99 = math.rsqrt %98 : vector<1x2xf32>
      %100 = vector.broadcast %99 : vector<1x2xf32> to vector<8x2xf32>
      %101 = arith.mulf %96, %100 : vector<8x2xf32>
      %102 = vector.broadcast %82 : vector<1x2xf32> to vector<8x2xf32>
      %103 = arith.mulf %101, %102 : vector<8x2xf32>
      %104 = vector.broadcast %83 : vector<1x2xf32> to vector<8x2xf32>
      %105 = arith.addf %103, %104 : vector<8x2xf32>
      %106 = arith.negf %105 : vector<8x2xf32>
      %107 = math.exp %106 : vector<8x2xf32>
      %cst_49 = arith.constant 1.000000e+00 : f32
      %108 = vector.broadcast %cst_49 : f32 to vector<8x2xf32>
      %109 = arith.addf %108, %107 : vector<8x2xf32>
      %110 = arith.divf %108, %109 : vector<8x2xf32>
      %c0_50 = arith.constant 0 : index
      %c0_51 = arith.constant 0 : index
      %111 = vector.load %arg6[%c0_50, %c0_51] : memref<8x2xf32, #tpu.memory_space<vmem>>, vector<8x2xf32>
      tpu.vector_store %arg6[%c0_50, %c0_51], %110 {strides = array<i32>} : memref<8x2xf32, #tpu.memory_space<vmem>>, vector<8x2xf32>,
    } else {
    }
    return
  }
  func.func @transform_0(%arg0: i32) -> (i32, i32, i32) {
    %c0_i32 = arith.constant 0 : i32
    %c0_i32_0 = arith.constant 0 : i32
    %c0_i32_1 = arith.constant 0 : i32
    return %c0_i32, %c0_i32_0, %arg0 : i32, i32, i32
  }
  func.func @transform_1(%arg0: i32) -> (i32, i32) {
    %c0_i32 = arith.constant 0 : i32
    %c0_i32_0 = arith.constant 0 : i32
    %c0_i32_1 = arith.constant 0 : i32
    return %c0_i32, %c0_i32_0 : i32, i32
  }
  func.func @transform_2(%arg0: i32) -> (i32, i32) {
    %c0_i32 = arith.constant 0 : i32
    %c0_i32_0 = arith.constant 0 : i32
    %c0_i32_1 = arith.constant 0 : i32
    return %c0_i32, %c0_i32_0 : i32, i32
  }
  func.func @transform_3(%arg0: i32) -> (i32, i32) {
    %c0_i32 = arith.constant 0 : i32
    %c0_i32_0 = arith.constant 0 : i32
    %c0_i32_1 = arith.constant 0 : i32
    return %c0_i32, %c0_i32_0 : i32, i32
  }
  func.func @transform_4(%arg0: i32) -> (i32, i32) {
    %c0_i32 = arith.constant 0 : i32
    %c0_i32_0 = arith.constant 0 : i32
    %c0_i32_1 = arith.constant 0 : i32
    return %c0_i32, %c0_i32_0 : i32, i32
  }
  func.func @transform_5(%arg0: i32) -> (i32, i32) {
    %c0_i32 = arith.constant 0 : i32
    %c0_i32_0 = arith.constant 0 : i32
    %c0_i32_1 = arith.constant 0 : i32
    return %c0_i32, %c0_i32_0 : i32, i32
  }
}

</mosaic_0001>

<bundles_post_ra>
// kernel: classification_forward.1
= control target key start
LH: loop header
LB: loop body
LE: loop exit
PB: predicated region body
PF: predicated region fallthrough
CT: control target
= control target key end

     0   :  { %vm60_vm0 = vcmask 64512   ;;  %vm25_vm1 = vcmask 261120   ;;  %vm651_vm2 = vmmov 0   ;;  %vm200_vm3 = vcmask 130112   ;;  %s958_s0 = inlined_call_operand.vmem [shape: f32[8,32,8], index: 0, kind: input, shape index: {}]   ;;  %s959_s1 = inlined_call_operand.vmem [shape: bf16[32,32], index: 1, kind: input, shape index: {}]   ;;  %s960_s3 = inlined_call_operand.vmem [shape: bf16[32,2], index: 3, kind: input, shape index: {}]   ;;  %s961_s2 = inlined_call_operand.vmem [shape: f32[2,32], index: 2, kind: input, shape index: {}]   ;;  %s962_s4 = inlined_call_operand.vmem [shape: f32[2,2], index: 4, kind: input, shape index: {}]   ;;  %s963_s5 = inlined_call_operand.vmem [shape: f32[8,2], index: 5, kind: output, shape index: {}]  }
   0x1   :  { %v32_v0 = vld [vmem:[%s958_s0 + $0x20] sm:$0xff]  ;;  %v33_v2 = vld [vmem:[%s958_s0 + $0x28] sm:$0xff]  ;;  %v34_v8 = vld [vmem:[%s958_s0 + $0x30] sm:$0xff]  ;;  %vm207_vm4 = vcmask 195712   ;;  %vm214_vm5 = vcmask 261312   ;;  %vm349_vm6 = vcmask 1041409  }
   0x2   :  { %v28_v1 = vld [vmem:[%s958_s0] sm:$0xff]  ;;  %v73_v3 = vsel %vm60_vm0, %v32_v0, -inf  ;;  %v29_v5 = vld [vmem:[%s958_s0 + $0x8] sm:$0xff]  ;;  %v76_v6 = vsel %vm60_vm0, %v33_v2, -inf  ;;  %v30_v9 = vld [vmem:[%s958_s0 + $0x10] sm:$0xff]  ;;  %v79_v10 = vsel %vm60_vm0, %v34_v8, -inf }
   0x3   :  { %v61_v4 = vsel %vm60_vm0, %v28_v1, -inf  ;;  %74 = vmax.xlane.f32.xlu1 %v73_v3  ;;  %v64_v7 = vsel %vm60_vm0, %v29_v5, -inf  ;;  %v67_v11 = vsel %vm60_vm0, %v30_v9, -inf  ;;  %v37_v12 = vld [vmem:[%s958_s0 + $0x48] sm:$0xff]  ;;  %v36_v13 = vld [vmem:[%s958_s0 + $0x40] sm:$0xff]  ;;  %v35_v16 = vld [vmem:[%s958_s0 + $0x38] sm:$0xff] }
   0x4   :  { %62 = vmax.xlane.f32.xlu0 %v61_v4  ;;  %v88_v14 = vsel %vm60_vm0, %v37_v12, -inf  ;;  %v85_v15 = vsel %vm60_vm0, %v36_v13, -inf  ;;  %v31_v17 = vld [vmem:[%s958_s0 + $0x18] sm:$0xff]  ;;  %v82_v18 = vsel %vm60_vm0, %v35_v16, -inf  ;;  %v40_v20 = vld [vmem:[%s958_s0 + $0x60] sm:$0xff]  ;;  %v38_v21 = vld [vmem:[%s958_s0 + $0x50] sm:$0xff] }
   0x5   :  { %v70_v19 = vsel %vm60_vm0, %v31_v17, -inf  ;;  %v97_v22 = vsel %vm60_vm0, %v40_v20, -inf  ;;  %v91_v23 = vsel %vm60_vm0, %v38_v21, -inf  ;;  %v39_v24 = vld [vmem:[%s958_s0 + $0x58] sm:$0xff]  ;;  %v41_v25 = vld [vmem:[%s958_s0 + $0x68] sm:$0xff]  ;;  %v44_v28 = vld [vmem:[%s958_s0 + $0x80] sm:$0xff]  ;;  %v189_v20 = vlaneseq }
   0x6   :  { %v94_v26 = vsel %vm60_vm0, %v39_v24, -inf  ;;  %v100_v27 = vsel %vm60_vm0, %v41_v25, -inf  ;;  %v42_v29 = vld [vmem:[%s958_s0 + $0x70] sm:$0xff]  ;;  %v109_v30 = vsel %vm60_vm0, %v44_v28, -inf  ;;  %v43_v32 = vld [vmem:[%s958_s0 + $0x78] sm:$0xff]  ;;  %v45_v33 = vld [vmem:[%s958_s0 + $0x88] sm:$0xff] }
   0x7   :  { %77 = vmax.xlane.f32.xlu1 %v76_v6  ;;  %v103_v31 = vsel %vm60_vm0, %v42_v29, -inf  ;;  %v106_v34 = vsel %vm60_vm0, %v43_v32, -inf  ;;  %v112_v35 = vsel %vm60_vm0, %v45_v33, -inf  ;;  %v48_v36 = vld [vmem:[%s958_s0 + $0xa0] sm:$0xff]  ;;  %v46_v37 = vld [vmem:[%s958_s0 + $0x90] sm:$0xff]  ;;  %v47_v40 = vld [vmem:[%s958_s0 + $0x98] sm:$0xff] }
   0x8   :  { %65 = vmax.xlane.f32.xlu0 %v64_v7  ;;  %v121_v38 = vsel %vm60_vm0, %v48_v36, -inf  ;;  %v115_v39 = vsel %vm60_vm0, %v46_v37, -inf  ;;  %v49_v41 = vld [vmem:[%s958_s0 + $0xa8] sm:$0xff]  ;;  %v118_v42 = vsel %vm60_vm0, %v47_v40, -inf  ;;  %v52_v44 = vld [vmem:[%s958_s0 + $0xc0] sm:$0xff]  ;;  %v50_v45 = vld [vmem:[%s958_s0 + $0xb0] sm:$0xff] }
   0x9   :  { %v124_v43 = vsel %vm60_vm0, %v49_v41, -inf  ;;  %v133_v46 = vsel %vm60_vm0, %v52_v44, -inf  ;;  %v127_v47 = vsel %vm60_vm0, %v50_v45, -inf  ;;  %v51_v48 = vld [vmem:[%s958_s0 + $0xb8] sm:$0xff]  ;;  %v53_v49 = vld [vmem:[%s958_s0 + $0xc8] sm:$0xff]  ;;  %v56_v52 = vld [vmem:[%s958_s0 + $0xe0] sm:$0xff] }
   0xa   :  { %v130_v50 = vsel %vm60_vm0, %v51_v48, -inf  ;;  %v136_v51 = vsel %vm60_vm0, %v53_v49, -inf  ;;  %v54_v53 = vld [vmem:[%s958_s0 + $0xd0] sm:$0xff]  ;;  %v145_v54 = vsel %vm60_vm0, %v56_v52, -inf  ;;  %v55_v56 = vld [vmem:[%s958_s0 + $0xd8] sm:$0xff]  ;;  %v57_v57 = vld [vmem:[%s958_s0 + $0xe8] sm:$0xff] }
   0xb   :  { %80 = vmax.xlane.f32.xlu1 %v79_v10  ;;  %v139_v55 = vsel %vm60_vm0, %v54_v53, -inf  ;;  %v142_v58 = vsel %vm60_vm0, %v55_v56, -inf  ;;  %v148_v59 = vsel %vm60_vm0, %v57_v57, -inf  ;;  %v58_v60 = vld [vmem:[%s958_s0 + $0xf0] sm:$0xff]  ;;  %v59_v61 = vld [vmem:[%s958_s0 + $0xf8] sm:$0xff]  ;;  %v649_v0 = vmov -inf  }
   0xc   :  { %68 = vmax.xlane.f32.xlu0 %v67_v11  ;;  %v151_v62 = vsel %vm60_vm0, %v58_v60, -inf  ;;  %v154_v63 = vsel %vm60_vm0, %v59_v61, -inf  ;;  %26 = vst.msk [vmem:[#allocation2] sm:$0xff] %vm25_vm1, %v649_v0  ;;  %v650_v1 = vmov 0.0   ;;  %v633_v2 = vld [vmem:[%s959_s1] sm:$0xff]   ;;  %v634_v3 = vld [vmem:[%s959_s1 + $0x8] sm:$0xff]  }
   0xd   :  { %614 = vmatprep.subr.bf16.mxu0 %v650_v1  ;;  %618 = vmatprep.mubr.msk.bf16.mxu0 %vm651_vm2, %v650_v1  ;;  %vm351_vm7 = vcmask 1042434   ;;  %vm353_vm8 = vcmask 1043459   ;;  %vm355_vm9 = vcmask 1044484   ;;  %vm357_vm10 = vcmask 1045509  }
   0xe   :  { %622 = vmatprep.subr.bf16.mxu1 %v650_v1  ;;  %626 = vmatprep.mubr.msk.bf16.mxu1 %vm651_vm2, %v650_v1  ;;  %vm359_vm11 = vcmask 1046534   ;;  %vm361_vm12 = vcmask 1047559   ;;  %vm554_vm14 = vcmask 15360  }
   0xf   :  { %89 = vmax.xlane.f32.xlu1 %v88_v14  ;;  %615 = vmatpush3.bf16.msra.mxu0 %v633_v2 }
  0x10   :  { %86 = vmax.xlane.f32.xlu0 %v85_v15  ;;  %616 = vmatprep.subr.bf16.mxu0 %v650_v1 }
  0x13   :  { %83 = vmax.xlane.f32.xlu1 %v82_v18  ;;  %617 = vmatpush3.bf16.msra.mxu0 %v634_v3 }
  0x14   :  { %71 = vmax.xlane.f32.xlu0 %v70_v19 }
  0x17   :  { %98 = vmax.xlane.f32.xlu1 %v97_v22 }
  0x18   :  { %92 = vmax.xlane.f32.xlu0 %v91_v23  ;;  %v190_v23 = vand.u32 127, %v189_v20 }
  0x1a   :  { %v202_v28 = vadd.s32 4294967280, %v190_v23  ;;  %v209_v29 = vadd.s32 4294967272, %v190_v23 }
  0x1b   :  { %95 = vmax.xlane.f32.xlu1 %v94_v26  ;;  %v195_v26 = vadd.s32 4294967288, %v190_v23 }
  0x1c   :  { %101 = vmax.xlane.f32.xlu0 %v100_v27  ;;  %v192_v27 = vshrl.u32 %v189_v20, 7 }
  0x1e   :  { %v842_v32 = vsub.s32 %v195_v26, %v192_v27  ;;  %v844_v33 = vsub.s32 %v190_v23, %v192_v27 }
  0x1f   :  { %110 = vmax.xlane.f32.xlu1 %v109_v30 }
  0x20   :  { %104 = vmax.xlane.f32.xlu0 %v103_v31 }
  0x23   :  { %107 = vmax.xlane.f32.xlu1 %v106_v34  ;;  %v846_v34 = vsub.s32 %v202_v28, %v192_v27 }
  0x24   :  { %113 = vmax.xlane.f32.xlu0 %v112_v35  ;;  %v848_v35 = vsub.s32 %v209_v29, %v192_v27 }
  0x27   :  { %122 = vmax.xlane.f32.xlu1 %v121_v38 }
  0x28   :  { %116 = vmax.xlane.f32.xlu0 %v115_v39 }
  0x2b   :  { %119 = vmax.xlane.f32.xlu1 %v118_v42 }
  0x2c   :  { %125 = vmax.xlane.f32.xlu0 %v124_v43 }
  0x2f   :  { %134 = vmax.xlane.f32.xlu1 %v133_v46 }
  0x30   :  { %128 = vmax.xlane.f32.xlu0 %v127_v47 }
  0x33   :  { %131 = vmax.xlane.f32.xlu1 %v130_v50 }
  0x34   :  { %137 = vmax.xlane.f32.xlu0 %v136_v51 }
  0x37   :  { %146 = vmax.xlane.f32.xlu1 %v145_v54 }
  0x38   :  { %140 = vmax.xlane.f32.xlu0 %v139_v55 }
  0x3b   :  { %143 = vmax.xlane.f32.xlu1 %v142_v58 }
  0x3c   :  { %149 = vmax.xlane.f32.xlu0 %v148_v59 }
  0x3f   :  { %155 = vmax.xlane.f32.xlu1 %v154_v63 }
  0x40   :  { %152 = vmax.xlane.f32.xlu0 %v151_v62 }
  0x90   :  { %v75_v4 = vpop.xlane.xlu1 %74 }
  0x91   :  { %v63_v5 = vpop.xlane.xlu0 %62  ;;  %v219_v40 = vrot.slane %v75_v4, %v844_v33 }
  0x92   :  { %v194_v41 = vrot.slane %v63_v5, %v844_v33 }
  0x94   :  { %v78_v6 = vpop.xlane.xlu1 %77 }
  0x95   :  { %v66_v7 = vpop.xlane.xlu0 %65  ;;  %v223_v38 = vrot.slane %v78_v6, %v842_v32 }
  0x96   :  { %v199_v39 = vrot.slane %v66_v7, %v842_v32 }
  0x97   :  { %v224_v51 = vsel %vm200_vm3, %v223_v38, %v219_v40 }
  0x98   :  { %v81_v8 = vpop.xlane.xlu1 %80  ;;  %v201_v52 = vsel %vm200_vm3, %v199_v39, %v194_v41 }
  0x99   :  { %v69_v9 = vpop.xlane.xlu0 %68  ;;  %v228_v42 = vrot.slane %v81_v8, %v846_v34 }
  0x9a   :  { %v206_v43 = vrot.slane %v69_v9, %v846_v34 }
  0x9b   :  { %v229_v54 = vsel %vm207_vm4, %v228_v42, %v224_v51  ;;  %v636_v51 = vld [vmem:[%s960_s3 + $0x8] sm:$0xff]  }
  0x9c   :  { %v90_v10 = vpop.xlane.xlu1 %89  ;;  %v208_v55 = vsel %vm207_vm4, %v206_v43, %v201_v52 }
  0x9d   :  { %v87_v11 = vpop.xlane.xlu0 %86  ;;  %v242_v44 = vrot.slane %v90_v10, %v842_v32 }
  0x9e   :  { %v238_v45 = vrot.slane %v87_v11, %v844_v33 }
  0xa0   :  { %v84_v12 = vpop.xlane.xlu1 %83  ;;  %v243_v56 = vsel %vm200_vm3, %v242_v44, %v238_v45  ;;  %v27_v45 = vld [vmem:[#allocation2] sm:$0xff] }
  0xa1   :  { %v72_v13 = vpop.xlane.xlu0 %71  ;;  %v233_v46 = vrot.slane %v84_v12, %v848_v35 }
  0xa2   :  { %v213_v47 = vrot.slane %v72_v13, %v848_v35 }
  0xa3   :  { %v234_v57 = vsel %vm214_vm5, %v233_v46, %v229_v54 }
  0xa4   :  { %v822_v14 = vpop.xlane.xlu1 %98  ;;  %v215_v58 = vsel %vm214_vm5, %v213_v47, %v208_v55 }
  0xa5   :  { %v93_v15 = vpop.xlane.xlu0 %92  ;;  %v257_v62 = vrot.slane %v822_v14, %v844_v33 }
  0xa6   :  { %v247_v50 = vrot.slane %v93_v15, %v846_v34 }
  0xa8   :  { %v96_v16 = vpop.xlane.xlu1 %95  ;;  %v248_v63 = vsel %vm207_vm4, %v247_v50, %v243_v56  ;;  %v635_v50 = vld [vmem:[%s960_s3] sm:$0xff]  }
  0xa9   :  { %v824_v17 = vpop.xlane.xlu0 %101  ;;  %v252_v53 = vrot.slane %v96_v16, %v848_v35  ;;  %623 = vmatpush3.bf16.msra.mxu1 %v635_v50 }
  0xaa   :  { %v261_v59 = vrot.slane %v824_v17, %v842_v32  ;;  %624 = vmatprep.subr.bf16.mxu1 %v650_v1 }
  0xab   :  { %v253_v3 = vsel %vm214_vm5, %v252_v53, %v248_v63 }
  0xac   :  { %v826_v18 = vpop.xlane.xlu1 %110  ;;  %v262_v11 = vsel %vm200_vm3, %v261_v59, %v257_v62 }
  0xad   :  { %v828_v19 = vpop.xlane.xlu0 %104  ;;  %v276_v7 = vrot.slane %v826_v18, %v844_v33  ;;  %625 = vmatpush3.bf16.msra.mxu1 %v636_v51 }
  0xae   :  { %v266_v0 = vrot.slane %v828_v19, %v846_v34 }
  0xb0   :  { %v830_v21 = vpop.xlane.xlu1 %107  ;;  %v267_v17 = vsel %vm207_vm4, %v266_v0, %v262_v11 }
  0xb1   :  { %v832_v22 = vpop.xlane.xlu0 %113  ;;  %v271_v4 = vrot.slane %v830_v21, %v848_v35 }
  0xb2   :  { %v280_v2 = vrot.slane %v832_v22, %v842_v32 }
  0xb3   :  { %v272_v21 = vsel %vm214_vm5, %v271_v4, %v267_v17 }
  0xb4   :  { %v834_v24 = vpop.xlane.xlu1 %122  ;;  %v281_v18 = vsel %vm200_vm3, %v280_v2, %v276_v7 }
  0xb5   :  { %v836_v25 = vpop.xlane.xlu0 %116  ;;  %v295_v12 = vrot.slane %v834_v24, %v844_v33 }
  0xb6   :  { %v285_v5 = vrot.slane %v836_v25, %v846_v34  ;;  %v350_v25 = vsel %vm349_vm6, %v234_v57, %v215_v58 }
  0xb7   :  { %v352_v29 = vsel %vm351_vm7, %v253_v3, %v350_v25 }
  0xb8   :  { %v838_v30 = vpop.xlane.xlu1 %119  ;;  %v286_v22 = vsel %vm207_vm4, %v285_v5, %v281_v18 }
  0xb9   :  { %v840_v31 = vpop.xlane.xlu0 %125  ;;  %v290_v8 = vrot.slane %v838_v30, %v848_v35 }
  0xba   :  { %v299_v6 = vrot.slane %v840_v31, %v842_v32 }
  0xbb   :  { %v291_v26 = vsel %vm214_vm5, %v290_v8, %v286_v22 }
  0xbc   :  { %v850_v36 = vpop.xlane.xlu1 %134  ;;  %v300_v23 = vsel %vm200_vm3, %v299_v6, %v295_v12  ;;  %v600_v12 = vld [vmem:[%s961_s2] ss:$0 sm:$0xff] }
  0xbd   :  { %v852_v37 = vpop.xlane.xlu0 %128  ;;  %v314_v19 = vrot.slane %v850_v36, %v844_v33 }
  0xbe   :  { %v304_v9 = vrot.slane %v852_v37, %v846_v34 }
  0xc0   :  { %v132_v48 = vpop.xlane.xlu1 %131  ;;  %v305_v27 = vsel %vm207_vm4, %v304_v9, %v300_v23 }
  0xc1   :  { %v138_v49 = vpop.xlane.xlu0 %137  ;;  %v309_v13 = vrot.slane %v132_v48, %v848_v35 }
  0xc2   :  { %v318_v10 = vrot.slane %v138_v49, %v842_v32 }
  0xc3   :  { %v310_v30 = vsel %vm214_vm5, %v309_v13, %v305_v27 }
  0xc4   :  { %v147_v60 = vpop.xlane.xlu1 %146  ;;  %v319_v28 = vsel %vm200_vm3, %v318_v10, %v314_v19 }
  0xc5   :  { %v141_v61 = vpop.xlane.xlu0 %140  ;;  %v333_v31 = vrot.slane %v147_v60, %v844_v33 }
  0xc6   :  { %v323_v14 = vrot.slane %v141_v61, %v846_v34 }
  0xc8   :  { %v144_v15 = vpop.xlane.xlu1 %143  ;;  %v324_v36 = vsel %vm207_vm4, %v323_v14, %v319_v28  ;;  %v601_v14 = vld [vmem:[%s961_s2 + $0x1] ss:$0 sm:$0xff] }
  0xc9   :  { %v150_v16 = vpop.xlane.xlu0 %149  ;;  %v328_v20 = vrot.slane %v144_v15, %v848_v35 }
  0xca   :  { %v337_v24 = vrot.slane %v150_v16, %v842_v32  ;;  %v354_v32 = vsel %vm353_vm8, %v272_v21, %v352_v29 }
  0xcb   :  { %v329_v39 = vsel %vm214_vm5, %v328_v20, %v324_v36  ;;  %v356_v42 = vsel %vm355_vm9, %v291_v26, %v354_v32 }
  0xcc   :  { %v156_v38 = vpop.xlane.xlu1 %155  ;;  %v338_v43 = vsel %vm200_vm3, %v337_v24, %v333_v31  ;;  %v358_v44 = vsel %vm357_vm10, %v310_v30, %v356_v42 }
  0xcd   :  { %v153_v37 = vpop.xlane.xlu0 %152  ;;  %v347_v41 = vrot.slane %v156_v38, %v848_v35  ;;  %v360_v46 = vsel %vm359_vm11, %v329_v39, %v358_v44 }
  0xce   :  { %v342_v40 = vrot.slane %v153_v37, %v846_v34 }
  0xd0   :  { %v343_v33 = vsel %vm207_vm4, %v342_v40, %v338_v43 }
  0xd1   :  { %v348_v47 = vsel %vm214_vm5, %v347_v41, %v343_v33 }
  0xd2   :  { %v362_v48 = vsel %vm361_vm12, %v348_v47, %v360_v46 }
  0xd3   :  { %v364_v49 = vmax.f32 %v27_v45, %v362_v48 }
  0xd5   :  { %366 = vst.msk [vmem:[#allocation2] sm:$0xff] %vm25_vm1, %v364_v49 }
  0xdc   :  { %v370_v34 = vld [vmem:[#allocation2] sm:$0xff] }
  0xdd   :  { %v371_v35 = vpack.c.bf16 %v370_v34, %v370_v34 }
  0xdf   :  { %619 = vmatmul.mubr.msk.bf16.vlgmr.msra.gmra.mrb[0].mxu0 %vm25_vm1, %v371_v35 }
 0x1b2   :  { %v425_v52 = vpop.f32.mrb[0].mxu0 }
 0x1b3   :  { %v433_v53 = vsel %vm25_vm1, %v425_v52, 0.0  ;;  %v620_v54 = vpop.f32.mrb[1].mxu0 }
 0x1b4   :  { %v434_v55 = vrot.slane %v433_v53, 4  ;;  %v428_v56 = vpop.f32.mrb[2].mxu0 }
 0x1b5   :  { %v621_v57 = vpop.f32.mrb[3].mxu0 }
 0x1b6   :  { %v435_v58 = vadd.f32 %v434_v55, %v433_v53 }
 0x1b8   :  { %v436_v59 = vrot.slane %v435_v58, 2 }
 0x1ba   :  { %v437_v60 = vadd.f32 %v436_v59, %v435_v58 }
 0x1bc   :  { %v438_v61 = vrot.slane %v437_v60, 1 }
 0x1be   :  { %v439_v62 = vadd.f32 %v438_v61, %v437_v60 }
 0x1c0   :  { %v441_v63 = vmul.f32 0.125, %v439_v62 }
 0x1c2   :  { %v442_v0 = vsub.f32 %v425_v52, %v441_v63 }
 0x1c4   :  { %v443_v2 = vmul.f32 %v442_v0, %v442_v0 }
 0x1c6   :  { %v444_v3 = vsel %vm25_vm1, %v443_v2, 0.0 }
 0x1c7   :  { %v445_v4 = vrot.slane %v444_v3, 4 }
 0x1c9   :  { %v446_v1 = vadd.f32 %v445_v4, %v444_v3  ;;  %v605_v4 = vld [vmem:[%s962_s4] ss:$0 sm:$0xff] }
 0x1cb   :  { %v447_v5 = vrot.slane %v446_v1, 2 }
 0x1cd   :  { %v448_v6 = vadd.f32 %v447_v5, %v446_v1  ;;  %v606_v5 = vld [vmem:[%s962_s4 + $0x1] ss:$0 sm:$0xff] }
 0x1cf   :  { %v449_v7 = vrot.slane %v448_v6, 1 }
 0x1d1   :  { %v450_v8 = vadd.f32 %v449_v7, %v448_v6 }
 0x1d3   :  { %v451_v9 = vmul.f32 0.125, %v450_v8 }
 0x1d5   :  { %v452_v10 = vadd.f32 1e-05, %v451_v9 }
 0x1d7   :  { %637 = vrsqrt.f32 %v452_v10 }
 0x1e1   :  { %v638_v11 = vpop.eup %637 }
 0x1e2   :  { %v454_v13 = vmul.f32 %v638_v11, %v442_v0 }
 0x1e4   :  { %v459_v15 = vmul.f32 %v600_v12, %v454_v13 }
 0x1e6   :  { %v464_v16 = vadd.f32 %v601_v14, %v459_v15 }
 0x1e8   :  { %v466_v17 = vmul.f32 0.70710677, %v464_v16  ;;  %v465_v42 = vmul.f32 0.5, %v464_v16 }
 0x1ea   :  { %v467_v18 = vand.u32 2147483647, %v466_v17  ;;  %vm487_vm13 = vcmp.ge.f32.partialorder %v466_v17, 0.0 }
 0x1ec   :  { %v468_v19 = vmul.f32 0.3275911, %v467_v18  ;;  %v481_v21 = vsub.f32 0.0, %v467_v18 }
 0x1ee   :  { %v469_v20 = vadd.f32 1.0, %v468_v19  ;;  %v482_v23 = vmul.f32 %v481_v21, %v467_v18 }
 0x1f0   :  { %639 = vrcp.f32 %v469_v20  ;;  %v483_v26 = vmul.f32 1.442695, %v482_v23 }
 0x1f2   :  { %641 = vpow2.f32 %v483_v26 }
 0x1fa   :  { %v640_v22 = vpop.eup %639 }
 0x1fb   :  { %v472_v24 = vmul.f32 1.0614054, %v640_v22 }
 0x1fc   :  { %v642_v38 = vpop.eup %641 }
 0x1fd   :  { %v473_v25 = vadd.f32 -1.4531521, %v472_v24 }
 0x1ff   :  { %v474_v27 = vmul.f32 %v640_v22, %v473_v25 }
 0x201   :  { %v475_v28 = vadd.f32 1.4214138, %v474_v27 }
 0x203   :  { %v476_v29 = vmul.f32 %v640_v22, %v475_v28 }
 0x205   :  { %v477_v30 = vadd.f32 -0.28449672, %v476_v29 }
 0x207   :  { %v478_v31 = vmul.f32 %v640_v22, %v477_v30 }
 0x209   :  { %v479_v36 = vadd.f32 0.2548296, %v478_v31 }
 0x20b   :  { %v480_v37 = vmul.f32 %v640_v22, %v479_v36 }
 0x20d   :  { %v485_v32 = vmul.f32 %v642_v38, %v480_v37 }
 0x20f   :  { %v486_v39 = vsub.f32 1.0, %v485_v32 }
 0x211   :  { %v488_v40 = vsub.f32 0.0, %v486_v39 }
 0x213   :  { %v489_v41 = vsel %vm487_vm13, %v486_v39, %v488_v40 }
 0x214   :  { %v490_v43 = vadd.f32 1.0, %v489_v41 }
 0x216   :  { %v491_v44 = vmul.f32 %v490_v43, %v465_v42 }
 0x218   :  { %v492_v33 = vpack.c.bf16 %v491_v44, %v491_v44 }
 0x21a   :  { %627 = vmatmul.mubr.msk.bf16.vlgmr.msra.gmra.mrb[0].mxu1 %vm25_vm1, %v492_v33 }
 0x2ed   :  { %v546_v45 = vpop.f32.mrb[0].mxu1 }
 0x2ee   :  { %v555_v46 = vsel %vm554_vm14, %v546_v45, 0.0  ;;  %v628_v47 = vpop.f32.mrb[1].mxu1 }
 0x2ef   :  { %v556_v48 = vrot.slane %v555_v46, 4  ;;  %v549_v49 = vpop.f32.mrb[2].mxu1 }
 0x2f0   :  { %v629_v34 = vpop.f32.mrb[3].mxu1 }
 0x2f1   :  { %v557_v35 = vadd.f32 %v556_v48, %v555_v46 }
 0x2f3   :  { %v558_v50 = vrot.slane %v557_v35, 2 }
 0x2f5   :  { %v559_v51 = vadd.f32 %v558_v50, %v557_v35 }
 0x2f7   :  { %v560_v52 = vrot.slane %v559_v51, 1 }
 0x2f9   :  { %v561_v53 = vadd.f32 %v560_v52, %v559_v51 }
 0x2fb   :  { %v562_v54 = vmul.f32 0.125, %v561_v53 }
 0x2fd   :  { %v563_v55 = vsub.f32 %v546_v45, %v562_v54 }
 0x2ff   :  { %v564_v56 = vmul.f32 %v563_v55, %v563_v55 }
 0x301   :  { %v565_v57 = vsel %vm554_vm14, %v564_v56, 0.0 }
 0x302   :  { %v566_v58 = vrot.slane %v565_v57, 4 }
 0x304   :  { %v567_v59 = vadd.f32 %v566_v58, %v565_v57 }
 0x306   :  { %v568_v60 = vrot.slane %v567_v59, 2 }
 0x308   :  { %v569_v61 = vadd.f32 %v568_v60, %v567_v59 }
 0x30a   :  { %v570_v62 = vrot.slane %v569_v61, 1 }
 0x30c   :  { %v571_v63 = vadd.f32 %v570_v62, %v569_v61 }
 0x30e   :  { %v572_v0 = vmul.f32 0.125, %v571_v63 }
 0x310   :  { %v573_v2 = vadd.f32 1e-05, %v572_v0 }
 0x312   :  { %643 = vrsqrt.f32 %v573_v2 }
 0x31c   :  { %v644_v3 = vpop.eup %643 }
 0x31d   :  { %v575_v1 = vmul.f32 %v644_v3, %v563_v55 }
 0x31f   :  { %v580_v6 = vmul.f32 %v605_v4, %v575_v1 }
 0x321   :  { %v585_v7 = vadd.f32 %v606_v5, %v580_v6 }
 0x323   :  { %v607_v8 = vmul.f32 -1.442695, %v585_v7 }
 0x325   :  { %645 = vpow2.f32 %v607_v8 }
 0x32f   :  { %v646_v9 = vpop.eup %645 }
 0x330   :  { %v589_v10 = vadd.f32 1.0, %v646_v9 }
 0x332   :  { %647 = vrcp.f32 %v589_v10 }
 0x33c   :  { %v648_v11 = vpop.eup %647 }
 0x33d   :  { %592 = vst.msk [vmem:[%s963_s5] sm:$0xff] %vm554_vm14, %v648_v11 }

</bundles_post_ra>
